<compile_context>
chip_gen: v7x
topology: tpu7x:2x2x1
jax: 0.10.0
libtpu: 0.0.40
codegen_flags: <defaults>
</compile_context>

<pallas_src>
import functools

import jax
import jax.numpy as jnp
from jax.experimental import pallas as pl
from jax.experimental.pallas import tpu as pltpu


# ---------------------------------------------------------------------------
# Kernel A: fused matmul + bias for ConvTranspose2d(kernel=2, stride=2).
# With non-overlapping taps the transposed conv is exactly
#   (N*H*W, Cin) @ (Cin, 4*Chalf) + bias,   columns ordered (di, dj, oc).
# ---------------------------------------------------------------------------
def _up_matmul_kernel(x_ref, w_ref, b_ref, o_ref):
    acc = jnp.dot(x_ref[...], w_ref[...], preferred_element_type=jnp.float32)
    o_ref[...] = (acc + b_ref[...]).astype(o_ref.dtype)


def conv_transpose2x2_stride2_matmul(x_flat, w_up2d, b_up4):
    # x_flat: (M, Cin);  w_up2d: (Cin, 4*Chalf);  b_up4: (1, 4*Chalf)
    M, Cin = x_flat.shape
    N4 = w_up2d.shape[1]
    tm = next((t for t in (512, 256, 128, 64, 32, 16, 8) if M % t == 0), M)
    return pl.pallas_call(
        _up_matmul_kernel,
        out_shape=jax.ShapeDtypeStruct((M, N4), x_flat.dtype),
        grid=(M // tm,),
        in_specs=[
            pl.BlockSpec((tm, Cin), lambda i: (i, 0)),
            pl.BlockSpec((Cin, N4), lambda i: (0, 0)),
            pl.BlockSpec((1, N4), lambda i: (0, 0)),
        ],
        out_specs=pl.BlockSpec((tm, N4), lambda i: (i, 0)),
        compiler_params=pltpu.CompilerParams(dimension_semantics=("parallel",)),
    )(x_flat, w_up2d, b_up4)


# ---------------------------------------------------------------------------
# Kernel B: fused DoubleConv (+ optional channel concat with the skip input).
# One grid step per batch element ("parallel" so v7x uses both TensorCores).
# ---------------------------------------------------------------------------
def _double_conv_kernel(has_skip, c_half, *refs):
    if has_skip:
        (x1_ref, x2_ref, w1_ref, b1_ref, w2_ref, b2_ref,
         o_ref, pad1, pad2) = refs
    else:
        (x1_ref, w1_ref, b1_ref, w2_ref, b2_ref,
         o_ref, pad1, pad2) = refs
        x2_ref = None

    _, OH, OW, _ = x1_ref.shape
    c_in = pad1.shape[-1]
    c_out = o_ref.shape[-1]
    n_pix = OH * OW

    # padding=1 and torch.cat(dim=1) materialized only in VMEM scratch.
    pad1[...] = jnp.zeros(pad1.shape, pad1.dtype)
    pad1[1:OH + 1, 1:OW + 1, 0:c_half] = x1_ref[0]
    if has_skip:
        pad1[1:OH + 1, 1:OW + 1, c_half:c_in] = x2_ref[0]

    def conv3x3_relu(src_ref, w_ref, b_ref, cin):
        # im2col: 9 shifted views concatenated on the lane axis -> one K=9*cin matmul.
        cols = []
        for ki in range(3):
            for kj in range(3):
                cols.append(src_ref[ki:ki + OH, kj:kj + OW, :].reshape(n_pix, cin))
        patch = jnp.concatenate(cols, axis=-1)                      # (n_pix, 9*cin)
        acc = jnp.dot(patch, w_ref[...], preferred_element_type=jnp.float32)
        return jnp.maximum(acc + b_ref[...], 0.0)                   # (n_pix, c_out) f32

    a1 = conv3x3_relu(pad1, w1_ref, b1_ref, c_in)
    pad2[...] = jnp.zeros(pad2.shape, pad2.dtype)
    pad2[1:OH + 1, 1:OW + 1, :] = a1.reshape(OH, OW, c_out)          # stays in VMEM
    a2 = conv3x3_relu(pad2, w2_ref, b2_ref, c_out)
    o_ref[0] = a2.astype(o_ref.dtype)                                # (n_pix, c_out)


def double_conv_block(x1_nhwc, x2_nhwc, w1, b1, w2, b2):
    # x1_nhwc: (N, OH, OW, Chalf) upsampled input; x2_nhwc: skip (same spatial) or None.
    n, oh, ow, ch = x1_nhwc.shape
    c_in = w1.shape[0] // 9
    c_out = w1.shape[1]
    n_pix = oh * ow
    has_skip = x2_nhwc is not None

    in_specs = [pl.BlockSpec((1, oh, ow, ch), lambda b: (b, 0, 0, 0))]
    args = [x1_nhwc]
    if has_skip:
        in_specs.append(pl.BlockSpec((1, oh, ow, ch), lambda b: (b, 0, 0, 0)))
        args.append(x2_nhwc)
    in_specs += [
        pl.BlockSpec((9 * c_in, c_out), lambda b: (0, 0)),
        pl.BlockSpec((1, c_out), lambda b: (0, 0)),
        pl.BlockSpec((9 * c_out, c_out), lambda b: (0, 0)),
        pl.BlockSpec((1, c_out), lambda b: (0, 0)),
    ]
    args += [w1, b1, w2, b2]

    out = pl.pallas_call(
        functools.partial(_double_conv_kernel, has_skip, ch),
        out_shape=jax.ShapeDtypeStruct((n, n_pix, c_out), x1_nhwc.dtype),
        grid=(n,),
        in_specs=in_specs,
        out_specs=pl.BlockSpec((1, n_pix, c_out), lambda b: (b, 0, 0)),
        scratch_shapes=[
            pltpu.VMEM((oh + 2, ow + 2, c_in), jnp.float32),   # padded concat input
            pltpu.VMEM((oh + 2, ow + 2, c_out), jnp.float32),  # padded conv1 output
        ],
        compiler_params=pltpu.CompilerParams(dimension_semantics=("parallel",)),
    )(*args)
    return out.reshape(n, oh, ow, c_out)                       # NHWC


# ---------------------------------------------------------------------------
# Parameters (deterministic synthetic init; kernel-ready layouts, hoisted here)
# ---------------------------------------------------------------------------
def init_params(key, in_channels, out_channels):
    half = in_channels // 2
    ks = jax.random.split(key, 10)
    r = lambda k, shape: 0.1 * jax.random.normal(k, shape, jnp.float32)

    up_w = r(ks[0], (in_channels, half, 2, 2))           # ConvTranspose2d (Cin, Cout, kH, kW)
    up_b = r(ks[1], (half,))
    dc1_w = r(ks[2], (3, 3, in_channels, out_channels))  # conv weights as (kH, kW, Cin, Cout)
    dc1_b = r(ks[3], (out_channels,))
    dc2_w = r(ks[4], (3, 3, out_channels, out_channels))
    dc2_b = r(ks[5], (out_channels,))
    dch1_w = r(ks[6], (3, 3, half, out_channels))
    dch1_b = r(ks[7], (out_channels,))
    dch2_w = r(ks[8], (3, 3, out_channels, out_channels))
    dch2_b = r(ks[9], (out_channels,))

    return {
        # columns ordered (di, dj, oc) to match the pixel-shuffle in the wrapper
        "up_w2d": jnp.transpose(up_w, (0, 2, 3, 1)).reshape(in_channels, 4 * half),
        "up_b4": jnp.tile(up_b, 4).reshape(1, 4 * half),
        "dc1_w": dc1_w.reshape(9 * in_channels, out_channels),
        "dc1_b": dc1_b.reshape(1, out_channels),
        "dc2_w": dc2_w.reshape(9 * out_channels, out_channels),
        "dc2_b": dc2_b.reshape(1, out_channels),
        "dch1_w": dch1_w.reshape(9 * half, out_channels),
        "dch1_b": dch1_b.reshape(1, out_channels),
        "dch2_w": dch2_w.reshape(9 * out_channels, out_channels),
        "dch2_b": dch2_b.reshape(1, out_channels),
    }


def upsample_forward(params, x1_nchw, x2_nchw=None):
    n, c_in, h, w = x1_nchw.shape
    half = c_in // 2

    # NCHW -> NHWC for the kernels (channels on the lane axis).
    x1 = jnp.transpose(x1_nchw, (0, 2, 3, 1))

    # ConvTranspose2d(k=2, s=2): one fused matmul+bias over M = N*H*W ...
    z = conv_transpose2x2_stride2_matmul(
        x1.reshape(n * h * w, c_in), params["up_w2d"], params["up_b4"])
    # ... followed by the (tiny, 8 KiB) pixel-shuffle reassembly in XLA.
    x1_up = (z.reshape(n, h, w, 2, 2, half)
               .transpose(0, 1, 3, 2, 4, 5)
               .reshape(n, 2 * h, 2 * w, half))

    if x2_nchw is not None:
        x2 = jnp.transpose(x2_nchw, (0, 2, 3, 1))
        y = double_conv_block(x1_up, x2,
                              params["dc1_w"], params["dc1_b"],
                              params["dc2_w"], params["dc2_b"])
    else:
        y = double_conv_block(x1_up, None,
                              params["dch1_w"], params["dch1_b"],
                              params["dch2_w"], params["dch2_b"])
    return jnp.transpose(y, (0, 3, 1, 2))   # NHWC -> NCHW


if __name__ == "__main__":
    key = jax.random.PRNGKey(0)
    kp, k1, k2 = jax.random.split(key, 3)

    in_channels, out_channels = 8, 4
    batch, h, w = 2, 8, 8          # x1 spatial; upsampled to 16x16

    params = init_params(kp, in_channels, out_channels)
    x1 = jax.random.normal(k1, (batch, in_channels, h, w), jnp.float32)                 # NCHW
    x2 = jax.random.normal(k2, (batch, in_channels // 2, 2 * h, 2 * w), jnp.float32)    # skip

    y_cat = upsample_forward(params, x1, x2)     # concat branch: DoubleConv(in, out)
    y_solo = upsample_forward(params, x1, None)  # solo branch:   DoubleConv(in//2, out)
    jax.block_until_ready((y_cat, y_solo))

    assert y_cat.shape == (batch, out_channels, 2 * h, 2 * w), y_cat.shape
    assert y_solo.shape == (batch, out_channels, 2 * h, 2 * w), y_solo.shape
    assert bool(jnp.isfinite(y_cat).all()) and bool(jnp.isfinite(y_solo).all())
    print("KERNEL_OK")
</pallas_src>

<mosaic_0001>
module attributes {stable_mosaic.version = 11 : i64} {
  func.func @_up_matmul_kernel(%arg0: i32, %arg1: memref<128x8xf32, #tpu.memory_space<vmem>>, %arg2: memref<8x16xf32, #tpu.memory_space<vmem>>, %arg3: memref<1x16xf32, #tpu.memory_space<vmem>>, %arg4: memref<128x16xf32, #tpu.memory_space<vmem>>) attributes {dimension_semantics = [#tpu.dimension_semantics<parallel>], iteration_bounds = array<i64: 1>, scalar_prefetch = 0 : i64, scratch_operands = 0 : i64, tpu.core_type = #tpu.core_type<tc>, window_params = [{transform_indices = @transform_0, window_bounds = array<i64: 128, 8>}, {pipeline_mode = #tpu.pipeline_mode<synchronous>, transform_indices = @transform_1, window_bounds = array<i64: 8, 16>}, {pipeline_mode = #tpu.pipeline_mode<synchronous>, transform_indices = @transform_2, window_bounds = array<i64: 1, 16>}, {transform_indices = @transform_3, window_bounds = array<i64: 128, 16>}]} {
    %c0 = arith.constant 0 : index
    %c0_0 = arith.constant 0 : index
    %0 = vector.load %arg1[%c0, %c0_0] : memref<128x8xf32, #tpu.memory_space<vmem>>, vector<128x8xf32>
    %c0_1 = arith.constant 0 : index
    %c0_2 = arith.constant 0 : index
    %1 = vector.load %arg2[%c0_1, %c0_2] : memref<8x16xf32, #tpu.memory_space<vmem>>, vector<8x16xf32>
    %cst = arith.constant dense<0.000000e+00> : vector<128x16xf32>
    %2 = tpu.matmul %0, %1, %cst {dimension_numbers = #tpu.dot_dimension_numbers<[1], [0], [0], [1], [0, 0, 1, 1], [], []>} : vector<128x8xf32>, vector<8x16xf32>, vector<128x16xf32> -> vector<128x16xf32>
    %c0_3 = arith.constant 0 : index
    %c0_4 = arith.constant 0 : index
    %3 = vector.load %arg3[%c0_3, %c0_4] : memref<1x16xf32, #tpu.memory_space<vmem>>, vector<1x16xf32>
    %4 = vector.broadcast %3 : vector<1x16xf32> to vector<128x16xf32>
    %5 = arith.addf %2, %4 : vector<128x16xf32>
    %c0_5 = arith.constant 0 : index
    %c0_6 = arith.constant 0 : index
    %6 = vector.load %arg4[%c0_5, %c0_6] : memref<128x16xf32, #tpu.memory_space<vmem>>, vector<128x16xf32>
    tpu.vector_store %arg4[%c0_5, %c0_6], %5 {strides = array<i32>} : memref<128x16xf32, #tpu.memory_space<vmem>>, vector<128x16xf32>,
    return
  }
  func.func @transform_0(%arg0: i32) -> (i32, i32) {
    %c0_i32 = arith.constant 0 : i32
    %c0_i32_0 = arith.constant 0 : i32
    return %arg0, %c0_i32 : i32, i32
  }
  func.func @transform_1(%arg0: i32) -> (i32, i32) {
    %c0_i32 = arith.constant 0 : i32
    %c0_i32_0 = arith.constant 0 : i32
    %c0_i32_1 = arith.constant 0 : i32
    return %c0_i32, %c0_i32_0 : i32, i32
  }
  func.func @transform_2(%arg0: i32) -> (i32, i32) {
    %c0_i32 = arith.constant 0 : i32
    %c0_i32_0 = arith.constant 0 : i32
    %c0_i32_1 = arith.constant 0 : i32
    return %c0_i32, %c0_i32_0 : i32, i32
  }
  func.func @transform_3(%arg0: i32) -> (i32, i32) {
    %c0_i32 = arith.constant 0 : i32
    %c0_i32_0 = arith.constant 0 : i32
    return %arg0, %c0_i32 : i32, i32
  }
}

</mosaic_0001>

<bundles_post_ra>
// kernel: tpu_custom_call.1
= control target key start
LH: loop header
LB: loop body
LE: loop exit
PB: predicated region body
PF: predicated region fallthrough
CT: control target
= control target key end

     0   :  { %vm38_vm0 = vcmask 64512   ;;  %vm232_vm1 = vcmask 130048   ;;  %s469_s1 = inlined_call_operand.vmem [shape: f32[8,16], index: 1, kind: input, shape index: {}]   ;;  %s470_s0 = inlined_call_operand.vmem [shape: f32[128,8], index: 0, kind: input, shape index: {}]   ;;  %s471_s2 = inlined_call_operand.vmem [shape: f32[1,16], index: 2, kind: input, shape index: {}]   ;;  %s472_s3 = inlined_call_operand.vmem [shape: f32[128,16], index: 3, kind: output, shape index: {}]  }
   0x1   :  { %v30_v0 = vld [vmem:[%s469_s1] sm:$0xff]  ;;  %v15_v3 = vld [vmem:[%s470_s0 + $0x8] sm:$0xff]  ;;  %v16_v5 = vld [vmem:[%s470_s0 + $0x10] sm:$0xff] }
   0x2   :  { %v14_v1 = vld [vmem:[%s470_s0] sm:$0xff]  ;;  %287 = vmatprep.subr.mxu0 %v30_v0  ;;  %313 = vmatprep.subr.mxu1 %v30_v0  ;;  %v23_v4 = vld [vmem:[%s470_s0 + $0x48] sm:$0xff]  ;;  %v24_v6 = vld [vmem:[%s470_s0 + $0x50] sm:$0xff] }
   0x3   :  { %v22_v2 = vld [vmem:[%s470_s0 + $0x40] sm:$0xff]  ;;  %288 = vmatpush3.msra.mxu0 %v30_v0  ;;  %314 = vmatpush3.msra.mxu1 %v30_v0  ;;  %v17_v7 = vld [vmem:[%s470_s0 + $0x18] sm:$0xff]  ;;  %v19_v11 = vld [vmem:[%s470_s0 + $0x28] sm:$0xff] }
   0x4   :  { %289 = vmatprep.mubr.msk.f32.mxu0 %vm38_vm0, %v14_v1  ;;  %301 = vmatprep.mubr.msk.f32.mxu1 %vm38_vm0, %v22_v2  ;;  %v25_v8 = vld [vmem:[%s470_s0 + $0x58] sm:$0xff]  ;;  %v18_v9 = vld [vmem:[%s470_s0 + $0x20] sm:$0xff]  ;;  %v27_v12 = vld [vmem:[%s470_s0 + $0x68] sm:$0xff] }
   0x5   :  { %290 = vmatmul.mubr.msk.f32.vlgmr.msra.gmra.mrb[0].mxu0 %vm38_vm0, %v15_v3  ;;  %302 = vmatmul.mubr.msk.f32.vlgmr.msra.gmra.mrb[0].mxu1 %vm38_vm0, %v23_v4  ;;  %v26_v10 = vld [vmem:[%s470_s0 + $0x60] sm:$0xff]  ;;  %v20_v13 = vld [vmem:[%s470_s0 + $0x30] sm:$0xff]  ;;  %v21_v15 = vld [vmem:[%s470_s0 + $0x38] sm:$0xff] }
   0x6   :  { %292 = vmatprep.mubr.msk.f32.mxu0 %vm38_vm0, %v16_v5  ;;  %304 = vmatprep.mubr.msk.f32.mxu1 %vm38_vm0, %v24_v6  ;;  %v28_v14 = vld [vmem:[%s470_s0 + $0x70] sm:$0xff]  ;;  %v29_v16 = vld [vmem:[%s470_s0 + $0x78] sm:$0xff]  ;;  %v253_v17 = vld [vmem:[%s471_s2] ss:$0 sm:$0xff] }
   0x9   :  { %293 = vmatmul.mubr.msk.f32.gmra.mrb[2].mxu0 %vm38_vm0, %v17_v7  ;;  %305 = vmatmul.mubr.msk.f32.gmra.mrb[2].mxu1 %vm38_vm0, %v25_v8 }
   0xa   :  { %295 = vmatprep.mubr.msk.f32.mxu0 %vm38_vm0, %v18_v9  ;;  %307 = vmatprep.mubr.msk.f32.mxu1 %vm38_vm0, %v26_v10 }
   0xd   :  { %296 = vmatmul.mubr.msk.f32.gmra.mrb[4].mxu0 %vm38_vm0, %v19_v11  ;;  %308 = vmatmul.mubr.msk.f32.gmra.mrb[4].mxu1 %vm38_vm0, %v27_v12 }
   0xe   :  { %298 = vmatprep.mubr.msk.f32.mxu0 %vm38_vm0, %v20_v13  ;;  %310 = vmatprep.mubr.msk.f32.mxu1 %vm38_vm0, %v28_v14 }
  0x11   :  { %299 = vmatmul.mubr.msk.f32.gmra.mrb[6].mxu0 %vm38_vm0, %v21_v15  ;;  %311 = vmatmul.mubr.msk.f32.gmra.mrb[6].mxu1 %vm38_vm0, %v29_v16 }
  0xd8   :  { %v291_v18 = vpop.f32.mrb[0].mxu0  ;;  %v303_v19 = vpop.f32.mrb[0].mxu1 }
  0xd9   :  { %v159_v20 = vadd.f32 %v291_v18, %v253_v17  ;;  %v199_v21 = vadd.f32 %v303_v19, %v253_v17  ;;  %v153_v22 = vpop.f32.mrb[1].mxu0  ;;  %v193_v23 = vpop.f32.mrb[1].mxu1 }
  0xda   :  { %v154_v24 = vadd.f32 %v253_v17, %v153_v22  ;;  %v194_v25 = vadd.f32 %v253_v17, %v193_v23 }
  0xdb   :  { %234 = vst.msk [vmem:[%s472_s3 + $0x8] sm:$0xff] %vm232_vm1, %v159_v20  ;;  %242 = vst.msk [vmem:[%s472_s3 + $0x48] sm:$0xff] %vm232_vm1, %v199_v21 }
  0xdc   :  { %233 = vst.msk [vmem:[%s472_s3] sm:$0xff] %vm232_vm1, %v154_v24  ;;  %241 = vst.msk [vmem:[%s472_s3 + $0x40] sm:$0xff] %vm232_vm1, %v194_v25  ;;  %v294_v26 = vpop.f32.mrb[2].mxu0  ;;  %v306_v27 = vpop.f32.mrb[2].mxu1 }
  0xdd   :  { %v169_v28 = vadd.f32 %v294_v26, %v253_v17  ;;  %v209_v29 = vadd.f32 %v306_v27, %v253_v17  ;;  %v163_v30 = vpop.f32.mrb[3].mxu0  ;;  %v203_v31 = vpop.f32.mrb[3].mxu1 }
  0xde   :  { %v164_v32 = vadd.f32 %v253_v17, %v163_v30  ;;  %v204_v33 = vadd.f32 %v253_v17, %v203_v31 }
  0xdf   :  { %236 = vst.msk [vmem:[%s472_s3 + $0x18] sm:$0xff] %vm232_vm1, %v169_v28  ;;  %244 = vst.msk [vmem:[%s472_s3 + $0x58] sm:$0xff] %vm232_vm1, %v209_v29 }
  0xe0   :  { %235 = vst.msk [vmem:[%s472_s3 + $0x10] sm:$0xff] %vm232_vm1, %v164_v32  ;;  %243 = vst.msk [vmem:[%s472_s3 + $0x50] sm:$0xff] %vm232_vm1, %v204_v33  ;;  %v297_v34 = vpop.f32.mrb[4].mxu0  ;;  %v309_v35 = vpop.f32.mrb[4].mxu1 }
  0xe1   :  { %v179_v36 = vadd.f32 %v297_v34, %v253_v17  ;;  %v219_v37 = vadd.f32 %v309_v35, %v253_v17  ;;  %v173_v38 = vpop.f32.mrb[5].mxu0  ;;  %v213_v39 = vpop.f32.mrb[5].mxu1 }
  0xe2   :  { %v174_v40 = vadd.f32 %v253_v17, %v173_v38  ;;  %v214_v41 = vadd.f32 %v253_v17, %v213_v39 }
  0xe3   :  { %238 = vst.msk [vmem:[%s472_s3 + $0x28] sm:$0xff] %vm232_vm1, %v179_v36  ;;  %246 = vst.msk [vmem:[%s472_s3 + $0x68] sm:$0xff] %vm232_vm1, %v219_v37 }
  0xe4   :  { %237 = vst.msk [vmem:[%s472_s3 + $0x20] sm:$0xff] %vm232_vm1, %v174_v40  ;;  %245 = vst.msk [vmem:[%s472_s3 + $0x60] sm:$0xff] %vm232_vm1, %v214_v41  ;;  %v300_v42 = vpop.f32.mrb[6].mxu0  ;;  %v312_v43 = vpop.f32.mrb[6].mxu1 }
  0xe5   :  { %v189_v44 = vadd.f32 %v300_v42, %v253_v17  ;;  %v229_v45 = vadd.f32 %v312_v43, %v253_v17  ;;  %v183_v46 = vpop.f32.mrb[7].mxu0  ;;  %v223_v47 = vpop.f32.mrb[7].mxu1 }
  0xe6   :  { %v184_v48 = vadd.f32 %v253_v17, %v183_v46  ;;  %v224_v49 = vadd.f32 %v253_v17, %v223_v47 }
  0xe7   :  { %240 = vst.msk [vmem:[%s472_s3 + $0x38] sm:$0xff] %vm232_vm1, %v189_v44  ;;  %248 = vst.msk [vmem:[%s472_s3 + $0x78] sm:$0xff] %vm232_vm1, %v229_v45 }
  0xe8   :  { %239 = vst.msk [vmem:[%s472_s3 + $0x30] sm:$0xff] %vm232_vm1, %v184_v48  ;;  %247 = vst.msk [vmem:[%s472_s3 + $0x70] sm:$0xff] %vm232_vm1, %v224_v49 }

</bundles_post_ra>
